<compile_context>
chip_gen: v6e
topology: v6e:2x2x1
jax: 0.10.0
libtpu: 0.0.40
codegen_flags: <defaults>
</compile_context>

<pallas_src>
import math

import jax
import jax.numpy as jnp
from jax.experimental import pallas as pl
from jax.experimental.pallas import tpu as pltpu


def _mpc_combiner_kernel(means_ref, logsig_ref,
                         post_mean_ref, post_logvar_ref, logz_ref):
    K = means_ref.shape[0]
    D = means_ref.shape[-1]
    log_2pi = math.log(2.0 * math.pi)

    prior_mean = means_ref[0].astype(jnp.float32)        # [TB, D]
    ls0 = logsig_ref[0].astype(jnp.float32)
    prior_var = jnp.exp(ls0)                             # running variance
    prior_prec = jnp.exp(-ls0)                           # running precision (1/var)

    # Hoisted constant term of the (K-1) Gaussian log-probs.
    logz_total = jnp.full(logz_ref.shape,
                          -(K - 1) * 0.5 * D * log_2pi, jnp.float32)  # [TB, 1]

    # K is small & static -> unrolled Python loop (strict sequential dependency).
    for i in range(1, K):
        mean2 = means_ref[i].astype(jnp.float32)
        logvar2 = logsig_ref[i].astype(jnp.float32)

        var2 = jnp.exp(logvar2)
        prec2 = jnp.exp(-logvar2)                        # exact 1/var2, no divide

        prec_new = prior_prec + prec2                    # combined precision
        # c_diag = 1/prec_new: approx EUP reciprocal + one Newton step (~1e-7 rel err)
        r = pl.reciprocal(prec_new, approx=True)
        c_diag = r * (2.0 - prec_new * r)                # combined variance (diag)
        c = c_diag * (prior_prec * prior_mean + prec2 * mean2)   # combined mean

        # log N(mean1; mean2, diag(var1 + var2 + 1e-6)), constant term hoisted.
        s = prior_var + var2 + 1e-6
        rs = pl.reciprocal(s, approx=True)
        inv_s = rs * (2.0 - s * rs)                      # Newton-refined 1/s
        diff = prior_mean - mean2
        # Single fused cross-lane reduction (logdet + quadratic form together).
        logz_total = logz_total - 0.5 * jnp.sum(
            jnp.log(s) + diff * diff * inv_s, axis=-1, keepdims=True)

        prior_mean = c
        prior_var = c_diag
        prior_prec = prec_new

    post_mean_ref[...] = prior_mean.astype(post_mean_ref.dtype)
    post_logvar_ref[...] = jnp.log(prior_var).astype(post_logvar_ref.dtype)
    logz_ref[...] = logz_total


def _round_up(x, m):
    return ((x + m - 1) // m) * m


def _vmem_capacity_bytes():
    try:
        return int(pltpu.get_tpu_info().vmem_capacity_bytes)
    except Exception:
        return 64 * 1024 * 1024          # conservative (v7x-sized) fallback


def _block_footprint_bytes(tb, K, D, in_itemsize):
    # 2 inputs * 2 pipeline buffers of (K, tb, D) at input dtype
    # + 2 outputs * 2 buffers of (tb, D) f32 + logz (tb, 1) f32 * 2 buffers
    # + ~8 f32 (tb, D) carried/temporary arrays the body keeps in flight.
    return (2 * 2 * K * tb * D * in_itemsize
            + 2 * 2 * tb * D * 4
            + 2 * 2 * tb * 4
            + 8 * tb * D * 4)


def _choose_tile_b(B, K, D, in_itemsize):
    """Pick a batch tile from a generation-gated VMEM budget."""
    cap = _vmem_capacity_bytes()
    # v5e/v6e: 128 MiB physical VMEM -> generous budget; v7x: 64 MiB -> tighter.
    budget = 64 * 1024 * 1024 if cap >= 100 * 1024 * 1024 else 24 * 1024 * 1024
    bytes_per_row = max(_block_footprint_bytes(1, K, D, in_itemsize), 1)
    tb = budget // bytes_per_row
    tb = max(8, min(2048, (tb // 8) * 8))
    return tb


def mpc_combiner(means, logsigmas, *, tile_b=None):
    """means, logsigmas: [K, B, D] (f32 or bf16).
    Returns (posterior_mean [B,D] f32, posterior_logvar [B,D] f32, log_z [B] f32)."""
    K, B, D = means.shape
    assert logsigmas.shape == (K, B, D)
    in_itemsize = means.dtype.itemsize

    if tile_b is None:
        tb = _choose_tile_b(B, K, D, in_itemsize)
    else:
        tb = max(8, _round_up(int(tile_b), 8))

    if B <= 8:
        tb = B                     # single tile: block dim equals full batch dim
    else:
        # Guarantee >= 2 grid tiles so ("parallel",) shards both v7x TensorCores
        # (costs only ~0.35 us of extra per-step overhead on single-TC chips).
        tb = max(8, min(tb, _round_up(pl.cdiv(B, 2), 8)))

    grid = (pl.cdiv(B, tb),)       # ragged last tile handled by Pallas (no jnp.pad)

    # Right-size the VMEM limit from the actual footprint (+25% headroom),
    # capped per generation (<= ~36 MiB on v7x, <= ~96 MiB on v5e/v6e).
    vmem_limit = int(_block_footprint_bytes(tb, K, D, in_itemsize) * 1.25)
    vmem_limit = max(vmem_limit, 16 * 1024 * 1024)
    cap = _vmem_capacity_bytes()
    vmem_limit = min(vmem_limit,
                     96 * 1024 * 1024 if cap >= 100 * 1024 * 1024
                     else 36 * 1024 * 1024)

    out_shapes = (
        jax.ShapeDtypeStruct((B, D), jnp.float32),
        jax.ShapeDtypeStruct((B, D), jnp.float32),
        jax.ShapeDtypeStruct((B, 1), jnp.float32),
    )
    grid_spec = pl.GridSpec(
        grid=grid,
        in_specs=[
            pl.BlockSpec((K, tb, D), lambda b: (0, b, 0)),
            pl.BlockSpec((K, tb, D), lambda b: (0, b, 0)),
        ],
        out_specs=[
            pl.BlockSpec((tb, D), lambda b: (b, 0)),
            pl.BlockSpec((tb, D), lambda b: (b, 0)),
            # log_z is tiny vs. the (tb, D) outputs; masked store here is negligible.
            pl.BlockSpec((tb, 1), lambda b: (b, 0)),
        ],
    )

    cost = pl.CostEstimate(
        flops=14 * (K - 1) * B * D,
        transcendentals=(3 * (K - 1) + 3) * B * D,
        bytes_accessed=2 * K * B * D * in_itemsize + (2 * B * D + B) * 4,
    )

    post_mean, post_logvar, log_z = pl.pallas_call(
        _mpc_combiner_kernel,
        out_shape=out_shapes,
        grid_spec=grid_spec,
        cost_estimate=cost,
        compiler_params=pltpu.CompilerParams(
            dimension_semantics=("parallel",),      # megacore split over batch tiles
            vmem_limit_bytes=vmem_limit,
        ),
    )(means, logsigmas)

    return post_mean, post_logvar, log_z.reshape(B)


def _reference(means, logsigmas):
    """Pure-JAX reference mirroring the PyTorch forward exactly."""
    K, B, D = means.shape
    prior_mean = means[0]
    prior_logvar = logsigmas[0]
    logz_total = jnp.zeros((B,), jnp.float32)
    for i in range(1, K):
        var1 = jnp.exp(prior_logvar)
        var2 = jnp.exp(logsigmas[i])
        mean2 = means[i]
        c_diag = 1.0 / (1.0 / var1 + 1.0 / var2)
        c = c_diag * (prior_mean / var1 + mean2 / var2)
        s = var1 + var2 + 1e-6
        diff = prior_mean - mean2
        log_z = -0.5 * (D * math.log(2.0 * math.pi)
                        + jnp.sum(jnp.log(s), -1)
                        + jnp.sum(diff * diff / s, -1))
        logz_total = logz_total + log_z
        prior_mean = c
        prior_logvar = jnp.log(c_diag)
    return prior_mean, prior_logvar, logz_total


if __name__ == "__main__":
    # Small deterministic inputs: K=3 modalities, batch=2, embedding dim=32.
    K, B, D = 3, 2, 32
    key = jax.random.PRNGKey(0)
    k_mean, k_logsig = jax.random.split(key)
    means = jax.random.normal(k_mean, (K, B, D), dtype=jnp.float32)
    logsigmas = 0.5 * jax.random.normal(k_logsig, (K, B, D), dtype=jnp.float32)

    post_mean, post_logvar, log_z = mpc_combiner(means, logsigmas)
    jax.block_until_ready((post_mean, post_logvar, log_z))

    ref_mean, ref_logvar, ref_logz = _reference(means, logsigmas)
    assert jnp.allclose(post_mean, ref_mean, atol=1e-4, rtol=1e-4)
    assert jnp.allclose(post_logvar, ref_logvar, atol=1e-4, rtol=1e-4)
    assert jnp.allclose(log_z, ref_logz, atol=1e-3, rtol=1e-4)

    # Also exercise the tiled, ragged-last-tile path (B % tile != 0, no padding).
    K2, B2, D2 = 3, 300, 128
    k1, k2 = jax.random.split(jax.random.PRNGKey(1))
    m2 = jax.random.normal(k1, (K2, B2, D2), dtype=jnp.float32)
    ls2 = 0.5 * jax.random.normal(k2, (K2, B2, D2), dtype=jnp.float32)
    pm2, plv2, lz2 = mpc_combiner(m2, ls2, tile_b=64)
    jax.block_until_ready((pm2, plv2, lz2))
    rm2, rlv2, rlz2 = _reference(m2, ls2)
    assert jnp.allclose(pm2, rm2, atol=1e-4, rtol=1e-4)
    assert jnp.allclose(plv2, rlv2, atol=1e-4, rtol=1e-4)
    assert jnp.allclose(lz2, rlz2, atol=1e-3, rtol=1e-4)

    print("KERNEL_OK")
</pallas_src>

<mosaic_0001>
module attributes {stable_mosaic.version = 11 : i64} {
  func.func @_mpc_combiner_kernel(%arg0: i32, %arg1: memref<3x2x32xf32, #tpu.memory_space<vmem>>, %arg2: memref<3x2x32xf32, #tpu.memory_space<vmem>>, %arg3: memref<2x32xf32, #tpu.memory_space<vmem>>, %arg4: memref<2x32xf32, #tpu.memory_space<vmem>>, %arg5: memref<2x1xf32, #tpu.memory_space<vmem>>) attributes {dimension_semantics = [#tpu.dimension_semantics<parallel>], iteration_bounds = array<i64: 1>, scalar_prefetch = 0 : i64, scratch_operands = 0 : i64, tpu.core_type = #tpu.core_type<tc>, window_params = [{transform_indices = @transform_0, window_bounds = array<i64: 3, 2, 32>}, {transform_indices = @transform_1, window_bounds = array<i64: 3, 2, 32>}, {transform_indices = @transform_2, window_bounds = array<i64: 2, 32>}, {transform_indices = @transform_3, window_bounds = array<i64: 2, 32>}, {transform_indices = @transform_4, window_bounds = array<i64: 2, 1>}]} {
    %c0 = arith.constant 0 : index
    %c0_0 = arith.constant 0 : index
    %c0_1 = arith.constant 0 : index
    %0 = vector.load %arg1[%c0, %c0_0, %c0_1] : memref<3x2x32xf32, #tpu.memory_space<vmem>>, vector<1x2x32xf32>
    %1 = vector.shape_cast %0 : vector<1x2x32xf32> to vector<2x32xf32>
    %c0_2 = arith.constant 0 : index
    %c0_3 = arith.constant 0 : index
    %c0_4 = arith.constant 0 : index
    %2 = vector.load %arg2[%c0_2, %c0_3, %c0_4] : memref<3x2x32xf32, #tpu.memory_space<vmem>>, vector<1x2x32xf32>
    %3 = vector.shape_cast %2 : vector<1x2x32xf32> to vector<2x32xf32>
    %4 = math.exp %3 : vector<2x32xf32>
    %cst = arith.constant 0.000000e+00 : f32
    %5 = vector.broadcast %cst : f32 to vector<2x32xf32>
    %6 = arith.subf %5, %3 : vector<2x32xf32>
    %7 = math.exp %6 : vector<2x32xf32>
    %cst_5 = arith.constant -58.8120651 : f32
    %8 = vector.broadcast %cst_5 : f32 to vector<2x1xf32>
    %c1 = arith.constant 1 : index
    %c0_6 = arith.constant 0 : index
    %c0_7 = arith.constant 0 : index
    %9 = vector.load %arg1[%c1, %c0_6, %c0_7] : memref<3x2x32xf32, #tpu.memory_space<vmem>>, vector<1x2x32xf32>
    %10 = vector.shape_cast %9 : vector<1x2x32xf32> to vector<2x32xf32>
    %c1_8 = arith.constant 1 : index
    %c0_9 = arith.constant 0 : index
    %c0_10 = arith.constant 0 : index
    %11 = vector.load %arg2[%c1_8, %c0_9, %c0_10] : memref<3x2x32xf32, #tpu.memory_space<vmem>>, vector<1x2x32xf32>
    %12 = vector.shape_cast %11 : vector<1x2x32xf32> to vector<2x32xf32>
    %13 = math.exp %12 : vector<2x32xf32>
    %cst_11 = arith.constant 0.000000e+00 : f32
    %14 = vector.broadcast %cst_11 : f32 to vector<2x32xf32>
    %15 = arith.subf %14, %12 : vector<2x32xf32>
    %16 = math.exp %15 : vector<2x32xf32>
    %17 = arith.addf %7, %16 : vector<2x32xf32>
    %18 = tpu.reciprocal %17 {approx = true} : vector<2x32xf32> -> vector<2x32xf32>
    %19 = arith.mulf %17, %18 : vector<2x32xf32>
    %cst_12 = arith.constant 2.000000e+00 : f32
    %20 = vector.broadcast %cst_12 : f32 to vector<2x32xf32>
    %21 = arith.subf %20, %19 : vector<2x32xf32>
    %22 = arith.mulf %18, %21 : vector<2x32xf32>
    %23 = arith.mulf %7, %1 : vector<2x32xf32>
    %24 = arith.mulf %16, %10 : vector<2x32xf32>
    %25 = arith.addf %23, %24 : vector<2x32xf32>
    %26 = arith.mulf %22, %25 : vector<2x32xf32>
    %27 = arith.addf %4, %13 : vector<2x32xf32>
    %cst_13 = arith.constant 9.99999997E-7 : f32
    %28 = vector.broadcast %cst_13 : f32 to vector<2x32xf32>
    %29 = arith.addf %27, %28 : vector<2x32xf32>
    %30 = tpu.reciprocal %29 {approx = true} : vector<2x32xf32> -> vector<2x32xf32>
    %31 = arith.mulf %29, %30 : vector<2x32xf32>
    %cst_14 = arith.constant 2.000000e+00 : f32
    %32 = vector.broadcast %cst_14 : f32 to vector<2x32xf32>
    %33 = arith.subf %32, %31 : vector<2x32xf32>
    %34 = arith.mulf %30, %33 : vector<2x32xf32>
    %35 = arith.subf %1, %10 : vector<2x32xf32>
    %36 = math.log %29 : vector<2x32xf32>
    %37 = arith.mulf %35, %35 : vector<2x32xf32>
    %38 = arith.mulf %37, %34 : vector<2x32xf32>
    %39 = arith.addf %36, %38 : vector<2x32xf32>
    %cst_15 = arith.constant dense<0.000000e+00> : vector<2xf32>
    %40 = vector.multi_reduction <add>, %39, %cst_15 [1] : vector<2x32xf32> to vector<2xf32>
    %41 = vector.shape_cast %40 : vector<2xf32> to vector<2x1xf32>
    %cst_16 = arith.constant 5.000000e-01 : f32
    %42 = vector.broadcast %cst_16 : f32 to vector<2x1xf32>
    %43 = arith.mulf %42, %41 : vector<2x1xf32>
    %44 = arith.subf %8, %43 : vector<2x1xf32>
    %c2 = arith.constant 2 : index
    %c0_17 = arith.constant 0 : index
    %c0_18 = arith.constant 0 : index
    %45 = vector.load %arg1[%c2, %c0_17, %c0_18] : memref<3x2x32xf32, #tpu.memory_space<vmem>>, vector<1x2x32xf32>
    %46 = vector.shape_cast %45 : vector<1x2x32xf32> to vector<2x32xf32>
    %c2_19 = arith.constant 2 : index
    %c0_20 = arith.constant 0 : index
    %c0_21 = arith.constant 0 : index
    %47 = vector.load %arg2[%c2_19, %c0_20, %c0_21] : memref<3x2x32xf32, #tpu.memory_space<vmem>>, vector<1x2x32xf32>
    %48 = vector.shape_cast %47 : vector<1x2x32xf32> to vector<2x32xf32>
    %49 = math.exp %48 : vector<2x32xf32>
    %cst_22 = arith.constant 0.000000e+00 : f32
    %50 = vector.broadcast %cst_22 : f32 to vector<2x32xf32>
    %51 = arith.subf %50, %48 : vector<2x32xf32>
    %52 = math.exp %51 : vector<2x32xf32>
    %53 = arith.addf %17, %52 : vector<2x32xf32>
    %54 = tpu.reciprocal %53 {approx = true} : vector<2x32xf32> -> vector<2x32xf32>
    %55 = arith.mulf %53, %54 : vector<2x32xf32>
    %cst_23 = arith.constant 2.000000e+00 : f32
    %56 = vector.broadcast %cst_23 : f32 to vector<2x32xf32>
    %57 = arith.subf %56, %55 : vector<2x32xf32>
    %58 = arith.mulf %54, %57 : vector<2x32xf32>
    %59 = arith.mulf %17, %26 : vector<2x32xf32>
    %60 = arith.mulf %52, %46 : vector<2x32xf32>
    %61 = arith.addf %59, %60 : vector<2x32xf32>
    %62 = arith.mulf %58, %61 : vector<2x32xf32>
    %63 = arith.addf %22, %49 : vector<2x32xf32>
    %cst_24 = arith.constant 9.99999997E-7 : f32
    %64 = vector.broadcast %cst_24 : f32 to vector<2x32xf32>
    %65 = arith.addf %63, %64 : vector<2x32xf32>
    %66 = tpu.reciprocal %65 {approx = true} : vector<2x32xf32> -> vector<2x32xf32>
    %67 = arith.mulf %65, %66 : vector<2x32xf32>
    %cst_25 = arith.constant 2.000000e+00 : f32
    %68 = vector.broadcast %cst_25 : f32 to vector<2x32xf32>
    %69 = arith.subf %68, %67 : vector<2x32xf32>
    %70 = arith.mulf %66, %69 : vector<2x32xf32>
    %71 = arith.subf %26, %46 : vector<2x32xf32>
    %72 = math.log %65 : vector<2x32xf32>
    %73 = arith.mulf %71, %71 : vector<2x32xf32>
    %74 = arith.mulf %73, %70 : vector<2x32xf32>
    %75 = arith.addf %72, %74 : vector<2x32xf32>
    %cst_26 = arith.constant dense<0.000000e+00> : vector<2xf32>
    %76 = vector.multi_reduction <add>, %75, %cst_26 [1] : vector<2x32xf32> to vector<2xf32>
    %77 = vector.shape_cast %76 : vector<2xf32> to vector<2x1xf32>
    %cst_27 = arith.constant 5.000000e-01 : f32
    %78 = vector.broadcast %cst_27 : f32 to vector<2x1xf32>
    %79 = arith.mulf %78, %77 : vector<2x1xf32>
    %80 = arith.subf %44, %79 : vector<2x1xf32>
    %c0_28 = arith.constant 0 : index
    %c0_29 = arith.constant 0 : index
    %81 = vector.load %arg3[%c0_28, %c0_29] : memref<2x32xf32, #tpu.memory_space<vmem>>, vector<2x32xf32>
    tpu.vector_store %arg3[%c0_28, %c0_29], %62 {strides = array<i32>} : memref<2x32xf32, #tpu.memory_space<vmem>>, vector<2x32xf32>,
    %82 = math.log %58 : vector<2x32xf32>
    %c0_30 = arith.constant 0 : index
    %c0_31 = arith.constant 0 : index
    %83 = vector.load %arg4[%c0_30, %c0_31] : memref<2x32xf32, #tpu.memory_space<vmem>>, vector<2x32xf32>
    tpu.vector_store %arg4[%c0_30, %c0_31], %82 {strides = array<i32>} : memref<2x32xf32, #tpu.memory_space<vmem>>, vector<2x32xf32>,
    %c0_32 = arith.constant 0 : index
    %c0_33 = arith.constant 0 : index
    %84 = vector.load %arg5[%c0_32, %c0_33] : memref<2x1xf32, #tpu.memory_space<vmem>>, vector<2x1xf32>
    tpu.vector_store %arg5[%c0_32, %c0_33], %80 {strides = array<i32>} : memref<2x1xf32, #tpu.memory_space<vmem>>, vector<2x1xf32>,
    return
  }
  func.func @transform_0(%arg0: i32) -> (i32, i32, i32) {
    %c0_i32 = arith.constant 0 : i32
    %c0_i32_0 = arith.constant 0 : i32
    %c0_i32_1 = arith.constant 0 : i32
    return %c0_i32, %arg0, %c0_i32_0 : i32, i32, i32
  }
  func.func @transform_1(%arg0: i32) -> (i32, i32, i32) {
    %c0_i32 = arith.constant 0 : i32
    %c0_i32_0 = arith.constant 0 : i32
    %c0_i32_1 = arith.constant 0 : i32
    return %c0_i32, %arg0, %c0_i32_0 : i32, i32, i32
  }
  func.func @transform_2(%arg0: i32) -> (i32, i32) {
    %c0_i32 = arith.constant 0 : i32
    %c0_i32_0 = arith.constant 0 : i32
    return %arg0, %c0_i32 : i32, i32
  }
  func.func @transform_3(%arg0: i32) -> (i32, i32) {
    %c0_i32 = arith.constant 0 : i32
    %c0_i32_0 = arith.constant 0 : i32
    return %arg0, %c0_i32 : i32, i32
  }
  func.func @transform_4(%arg0: i32) -> (i32, i32) {
    %c0_i32 = arith.constant 0 : i32
    %c0_i32_0 = arith.constant 0 : i32
    return %arg0, %c0_i32 : i32, i32
  }
}

</mosaic_0001>

<bundles_post_ra>
// kernel: tpu_custom_call.1
= control target key start
LH: loop header
LB: loop body
LE: loop exit
PB: predicated region body
PF: predicated region fallthrough
CT: control target
= control target key end

     0   :  { %10 = vsyncpa [#allocation3], 0  ;;  %s332_s0 = inlined_call_operand.hbm [shape: f32[3,2,32], index: 0, kind: input, shape index: {}]   ;;  %s333_s1 = inlined_call_operand.hbm [shape: f32[3,2,32], index: 1, kind: input, shape index: {}]   ;;  %s334_s2 = inlined_call_operand.hbm [shape: f32[2,32], index: 2, kind: output, shape index: {0}]   ;;  %s335_s3 = inlined_call_operand.hbm [shape: f32[2,32], index: 3, kind: output, shape index: {1}]   ;;  %s336_s4 = inlined_call_operand.vmem [shape: f32[2,1], index: 4, kind: output, shape index: {2}]  }
   0x1   :  { %11 = vsyncpa [#allocation6], 0 }
   0x2   :  { %12 = vsyncpa [#allocation4], 0 }
   0x3   :  { %13 = vsyncpa [#allocation9], 0  ;;  %s282_s15 = smov [#allocation2]  }
   0x4   :  { %s19_s16 = sshll.u32 %s282_s15, 4  ;;  %s20_s16 = int_to_ptr.vmem [resolvable:$true] %s19_s16 }
   0x5   :  { %s202_s17 = scalar_lea.vmem %s20_s16, 96  ;;  %p207_p1 = scmp.lt.s32.totalorder %s20_s16, %s20_s16 }
   0x6   :  { %p203_p0 = scmp.ne.s32.totalorder %s20_s16, %s202_s17  ;;  %p208_p2 = scmp.lt.s32.totalorder %s202_s17, %s202_s17 }
   0x8   :  { %p209_p3 = por %p208_p2, %p207_p1 }
   0xa   :  { %p210_p4 = pnand %p209_p3, %p203_p0 }
   0xc   :  { %213 = shalt.err (!%p210_p4)
}
   0xd   :  { %s283_s18 = smov 32   ;;  %s284_s19 = smov 2  }
   0xe   :  { %25 = dma.hbm_to_vmem [thread:$0]  %s332_s0, 96, %s20_s16, [#allocation3], %s283_s18, %s283_s18, %s284_s19  }
   0xf   :  { %s285_s22 = smov [#allocation5]  }
  0x10   :  { %s31_s23 = sshll.u32 %s285_s22, 4  ;;  %s32_s23 = int_to_ptr.vmem [resolvable:$true] %s31_s23 }
  0x11   :  { %s222_s24 = scalar_lea.vmem %s32_s23, 96  ;;  %p227_p6 = scmp.lt.s32.totalorder %s32_s23, %s32_s23 }
  0x12   :  { %p223_p5 = scmp.ne.s32.totalorder %s32_s23, %s222_s24  ;;  %p228_p7 = scmp.lt.s32.totalorder %s222_s24, %s222_s24 }
  0x14   :  { %p229_p8 = por %p228_p7, %p227_p6 }
  0x16   :  { %p230_p9 = pnand %p229_p8, %p223_p5 }
  0x18   :  { %233 = shalt.err (!%p230_p9)
}
  0x19   :  { %37 = dma.hbm_to_vmem [thread:$0]  %s333_s1, 96, %s32_s23, [#allocation6], %s283_s18, %s283_s18, %s284_s19  }
  0x1a   :  { %274 = dma.done.wait [#allocation3], 96  }
  0x1b   :  { %275 = vsyncadd [#allocation3], 4294967200 }
  0x1c   :  { %276 = dma.done.wait [#allocation6], 96  }
  0x1d   :  { %277 = vsyncadd [#allocation6], 4294967200  ;;  %v45_v0 = vld [vmem:[#allocation5] sm:$0x3]  ;;  %v54_v3 = vld [vmem:[#allocation5 + $0x2] sm:$0x3] }
  0x1e   :  { %v46_v1 = vmul.f32 1.442695, %v45_v0  ;;  %v48_v2 = vsub.f32 0.0, %v45_v0  ;;  %v55_v4 = vmul.f32 1.442695, %v54_v3  ;;  %v57_v5 = vsub.f32 0.0, %v54_v3 }
  0x1f   :  { %v90_v15 = vld [vmem:[#allocation5 + $0x4] sm:$0x3]  ;;  %v44_v19 = vld [vmem:[#allocation2] sm:$0x3]  ;;  %v52_v20 = vld [vmem:[#allocation2 + $0x2] sm:$0x3] }
  0x20   :  { %168 = vpow2.f32 %v46_v1  ;;  %v49_v6 = vmul.f32 1.442695, %v48_v2  ;;  %v58_v7 = vmul.f32 1.442695, %v57_v5  ;;  %v91_v16 = vmul.f32 1.442695, %v90_v15 }
  0x21   :  { %170 = vpow2.f32 %v55_v4  ;;  %v93_v17 = vsub.f32 0.0, %v90_v15  ;;  %v75_v21 = vsub.f32 %v44_v19, %v52_v20  ;;  %vm81_vm0 = vcmask 254976   ;;  %v88_v45 = vld [vmem:[#allocation2 + $0x4] sm:$0x3]  ;;  %s286_s0 = smov [#allocation7]   ;;  %s287_s27 = smov [#allocation8]  }
  0x22   :  { %172 = vpow2.f32 %v49_v6  ;;  %s134_s1 = sshll.u32 %s286_s0, 4  ;;  %s144_s28 = sshll.u32 %s287_s27, 4  ;;  %s135_s1 = int_to_ptr.vmem [resolvable:$true] %s134_s1  ;;  %s145_s28 = int_to_ptr.vmem [resolvable:$true] %s144_s28 }
  0x23   :  { %174 = vpow2.f32 %v58_v7  ;;  %v94_v18 = vmul.f32 1.442695, %v93_v17  ;;  %v78_v27 = vmul.f32 %v75_v21, %v75_v21  ;;  %s234_s29 = scalar_lea.vmem %s135_s1, 32  ;;  %p239_p11 = scmp.lt.s32.totalorder %s135_s1, %s135_s1 }
  0x24   :  { %p235_p10 = scmp.ne.s32.totalorder %s135_s1, %s234_s29  ;;  %p240_p12 = scmp.lt.s32.totalorder %s234_s29, %s234_s29 }
  0x26   :  { %p241_p13 = por %p240_p12, %p239_p11 }
  0x28   :  { %p242_p0 = pnand %p241_p13, %p235_p10 }
  0x2d   :  { %v169_v8 = vpop.eup %168 }
  0x2e   :  { %v171_v9 = vpop.eup %170 }
  0x2f   :  { %v173_v10 = vpop.eup %172  ;;  %v69_v11 = vadd.f32 %v171_v9, %v169_v8 }
  0x30   :  { %v175_v12 = vpop.eup %174  ;;  %v65_v41 = vmul.f32 %v173_v10, %v44_v19 }
  0x31   :  { %v70_v13 = vadd.f32 1e-06, %v69_v11  ;;  %v60_v14 = vadd.f32 %v175_v12, %v173_v10  ;;  %v66_v40 = vmul.f32 %v175_v12, %v52_v20 }
  0x33   :  { %176 = vrcp.f32 %v70_v13  ;;  %v67_v43 = vadd.f32 %v66_v40, %v65_v41 }
  0x34   :  { %178 = vlog2.f32 %v70_v13 }
  0x35   :  { %180 = vrcp.f32 %v60_v14 }
  0x36   :  { %182 = vpow2.f32 %v91_v16 }
  0x37   :  { %184 = vpow2.f32 %v94_v18 }
  0x40   :  { %v177_v22 = vpop.eup %176 }
  0x41   :  { %v179_v23 = vpop.eup %178  ;;  %v72_v24 = vmul.f32 %v177_v22, %v70_v13 }
  0x42   :  { %v181_v25 = vpop.eup %180  ;;  %v77_v30 = vmul.f32 0.6931472, %v179_v23 }
  0x43   :  { %v73_v26 = vsub.f32 2.0, %v72_v24  ;;  %v62_v28 = vmul.f32 %v181_v25, %v60_v14  ;;  %v183_v32 = vpop.eup %182 }
  0x44   :  { %v185_v37 = vpop.eup %184 }
  0x45   :  { %v74_v29 = vmul.f32 %v177_v22, %v73_v26  ;;  %v63_v31 = vsub.f32 2.0, %v62_v28  ;;  %v96_v42 = vadd.f32 %v185_v37, %v60_v14  ;;  %v102_v61 = vmul.f32 %v185_v37, %v88_v45 }
  0x47   :  { %v79_v33 = vmul.f32 %v78_v27, %v74_v29  ;;  %v64_v34 = vmul.f32 %v181_v25, %v63_v31 }
  0x49   :  { %v80_v35 = vadd.f32 %v79_v33, %v77_v30  ;;  %v105_v36 = vadd.f32 %v183_v32, %v64_v34  ;;  %v68_v44 = vmul.f32 %v67_v43, %v64_v34 }
  0x4b   :  { %v82_v38 = vsel %vm81_vm0, %v80_v35, 0.0  ;;  %v106_v39 = vadd.f32 1e-06, %v105_v36  ;;  %v111_v46 = vsub.f32 %v68_v44, %v88_v45  ;;  %v101_v62 = vmul.f32 %v68_v44, %v60_v14 }
  0x4c   :  { %83 = vadd.xlane.f32.xlu0 %v82_v38 }
  0x4d   :  { %186 = vrcp.f32 %v106_v39  ;;  %v114_v52 = vmul.f32 %v111_v46, %v111_v46  ;;  %v103_v63 = vadd.f32 %v102_v61, %v101_v62 }
  0x4e   :  { %188 = vlog2.f32 %v106_v39 }
  0x4f   :  { %190 = vrcp.f32 %v96_v42 }
  0x5a   :  { %v187_v47 = vpop.eup %186 }
  0x5b   :  { %v189_v48 = vpop.eup %188  ;;  %v108_v49 = vmul.f32 %v187_v47, %v106_v39 }
  0x5c   :  { %v191_v50 = vpop.eup %190  ;;  %v113_v55 = vmul.f32 0.6931472, %v189_v48 }
  0x5d   :  { %v109_v51 = vsub.f32 2.0, %v108_v49  ;;  %v98_v53 = vmul.f32 %v191_v50, %v96_v42 }
  0x5f   :  { %v110_v54 = vmul.f32 %v187_v47, %v109_v51  ;;  %v99_v56 = vsub.f32 2.0, %v98_v53 }
  0x61   :  { %v115_v57 = vmul.f32 %v114_v52, %v110_v54  ;;  %v100_v58 = vmul.f32 %v191_v50, %v99_v56 }
  0x63   :  { %v116_v59 = vadd.f32 %v115_v57, %v113_v55  ;;  %192 = vlog2.f32 %v100_v58  ;;  %v104_v1 = vmul.f32 %v103_v63, %v100_v58 }
  0x65   :  { %v117_v60 = vsel %vm81_vm0, %v116_v59, 0.0  ;;  %122 = vst.msk [vmem:[#allocation7] sm:$0x3] %vm81_vm0, %v104_v1 }
  0x66   :  { %118 = vadd.xlane.f32.xlu0 %v117_v60 }
  0x70   :  { %v193_v0 = vpop.eup %192 }
  0x71   :  { %v124_v2 = vmul.f32 0.6931472, %v193_v0 }
  0x73   :  { %125 = vst.msk [vmem:[#allocation8] sm:$0x3] %vm81_vm0, %v124_v2 }
  0x74   :  { %245 = shalt.err (!%p242_p0)
}
  0x75   :  { %137 = dma.vmem_to_hbm [thread:$0]  %s135_s1, 32, %s334_s2, [#allocation4]  }
  0x76   :  { %s254_s6 = scalar_lea.vmem %s145_s28, 32  ;;  %p259_p2 = scmp.lt.s32.totalorder %s145_s28, %s145_s28 }
  0x77   :  { %p255_p1 = scmp.ne.s32.totalorder %s145_s28, %s254_s6  ;;  %p260_p3 = scmp.lt.s32.totalorder %s254_s6, %s254_s6 }
  0x79   :  { %p261_p4 = por %p260_p3, %p259_p2 }
  0x7b   :  { %p262_p5 = pnand %p261_p4, %p255_p1 }
  0x7d   :  { %265 = shalt.err (!%p262_p5)
}
  0x7e   :  { %147 = dma.vmem_to_hbm [thread:$0]  %s145_s28, 32, %s335_s3, [#allocation9]   ;;  %vm126_vm1 = vcmask 1024  }
  0xd5   :  { %v84_v3 = vpop.xlane.xlu0 %83 }
  0xd6   :  { %v85_v4 = vmul.f32 0.5, %v84_v3 }
  0xd8   :  { %v86_v6 = vsub.f32 -58.812065, %v85_v4 }
  0xef   :  { %v119_v5 = vpop.xlane.xlu0 %118 }
  0xf0   :  { %v120_v7 = vmul.f32 0.5, %v119_v5 }
  0xf2   :  { %v121_v8 = vsub.f32 %v86_v6, %v120_v7 }
  0xf4   :  { %127 = vst.msk [vmem:[%s336_s4] sm:$0x3] %vm126_vm1, %v121_v8 }
  0xf5   :  { %278 = dma.done.wait [#allocation4], 32  }
  0xf6   :  { %279 = vsyncadd [#allocation4], 4294967264 }
  0xf7   :  { %280 = dma.done.wait [#allocation9], 32  }
  0xf8   :  { %281 = vsyncadd [#allocation9], 4294967264 }
  0xf9   :  { %158 = vsyncpa [#allocation3], 1 }
  0xfa   :  { %159 = vsyncpa [#allocation6], 1 }
  0xfb   :  { %160 = vsyncpa [#allocation4], 1 }
  0xfc   :  { %161 = vsyncpa [#allocation9], 1 }

</bundles_post_ra>
